<compile_context>
chip_gen: v7x
topology: tpu7x:2x2x1
jax: 0.10.0
libtpu: 0.0.40
codegen_flags: <defaults>
</compile_context>

<pallas_src>
import functools

import jax
import jax.numpy as jnp
from jax.experimental import pallas as pl
from jax.experimental.pallas import tpu as pltpu


def _focal_loss_kernel(logits_ref, target_ref, alpha_ref, out_ref,
                       m_scr, s_scr, xt_scr, *,
                       gamma, use_alpha, n_total, v_total, tile_n, tile_v):
    i = pl.program_id(0)          # row-tile index   ("parallel")
    j = pl.program_id(1)          # vocab-chunk index ("arbitrary", innermost)

    xb = logits_ref[...]          # (tile_n, tile_v), native dtype (bf16 stays bf16)
    t = target_ref[...]           # (tile_n, 1) int32
    tn, tv = xb.shape

    col = jax.lax.broadcasted_iota(jnp.int32, (tn, tv), 1) + j * tile_v
    if v_total % tile_v != 0:
        # Ragged last vocab chunk: poison out-of-range columns so they lose
        # the max and contribute exp(-inf) == 0 to the sum-exp.
        xb = jnp.where(col < v_total, xb, jnp.full_like(xb, -jnp.inf))

    @pl.when(j == 0)
    def _():
        m_scr[...] = jnp.full_like(m_scr, -jnp.inf)
        s_scr[...] = jnp.zeros_like(s_scr)
        xt_scr[...] = jnp.zeros_like(xt_scr)

    # Pass 1 over the chunk (native dtype): row max fused with the target
    # gather.  At most one lane matches per row, so the native-dtype sum of
    # the masked values is exact.
    chunk_max = jnp.max(xb, axis=-1, keepdims=True).astype(jnp.float32)
    tmask = col == t
    xt_chunk = jnp.sum(jnp.where(tmask, xb, jnp.zeros_like(xb)),
                       axis=-1, keepdims=True).astype(jnp.float32)

    # Pass 2 (f32): online log-sum-exp accumulation across vocab chunks.
    m_old = m_scr[...]
    m_new = jnp.maximum(m_old, chunk_max)
    z = xb.astype(jnp.float32) - m_new
    sum_chunk = jnp.sum(jnp.exp(z), axis=-1, keepdims=True)
    s_scr[...] = s_scr[...] * jnp.exp(m_old - m_new) + sum_chunk
    m_scr[...] = m_new
    xt_scr[...] = xt_scr[...] + xt_chunk

    @pl.when(j == pl.num_programs(1) - 1)
    def _():
        # log p_t = x[target] - logsumexp(x)
        logpt = (xt_scr[...] - m_scr[...]) - jnp.log(s_scr[...])  # (tile_n, 1)
        pt = jnp.exp(logpt)                                        # before alpha
        if use_alpha:
            logpt = logpt * alpha_ref[...]     # hoisted alpha[target] (per row)

        # (1 - pt) ** gamma, specialized at trace time for small integer gamma.
        base = 1.0 - pt
        g = float(gamma)
        if g == 0.0:
            focal = jnp.ones_like(base)
        elif g.is_integer() and 0.0 < g <= 8.0:
            focal = base
            for _ in range(int(g) - 1):
                focal = focal * base
        else:
            # pow(base, gamma) for base >= 0 via exp/log (EUP); pow(0, g) == 0.
            focal = jnp.where(base > 0.0,
                              jnp.exp(g * jnp.log(jnp.maximum(base, 1e-30))),
                              0.0)

        loss = -1.0 * focal * logpt                                # (tile_n, 1)

        # Mask out-of-range rows of a ragged last row tile before reducing.
        row = jax.lax.broadcasted_iota(jnp.int32, (tn, 1), 0) + i * tile_n
        loss = jnp.where(row < n_total, loss, 0.0)

        # One partial sum per row tile; wrapper does the global sum / mean.
        out_ref[...] = jnp.reshape(jnp.sum(loss), (1, 1, 1))


def _choose_tiles(n, v, dtype):
    """Pick (tile_n, tile_v) against the *full* on-chip working set.

    Per element the kernel holds ~2x the double-buffered native-dtype input
    block plus ~4 full-width 32-bit temporaries (f32 cast / z, exp(z), column
    iota, mask), so the budget is sized with 2*itemsize + 16 bytes/element.
    """
    itemsize = jnp.dtype(dtype).itemsize
    sublane = max(8, 32 // max(1, itemsize))        # 8 for f32, 16 for bf16
    per_elem_bytes = 2 * itemsize + 16
    budget = 24 * 1024 * 1024                       # under the 48 MiB scoped limit
    max_elems = max(sublane * 128, budget // per_elem_bytes)

    tile_v = v
    max_rows = max(sublane, (max_elems // max(1, v)) // sublane * sublane)
    if max_rows < 128 and v > 4096:
        # Huge vocab: chunk V (online log-sum-exp path) instead of shrinking
        # the row tile to a handful of rows.
        tile_v = 4096
        max_rows = max(sublane, (max_elems // tile_v) // sublane * sublane)

    tile_n = min(max_rows, 1024)
    if n <= tile_n:
        if n > 2 * sublane:
            # Keep >= 2 row tiles so the "parallel" axis can shard across both
            # v7x TensorCores instead of collapsing to one block.
            half = -(-n // 2)
            tile_n = min(tile_n, -(-half // sublane) * sublane)
        else:
            tile_n = n          # single full-extent block (always layout-legal)
    return tile_n, tile_v


def focal_loss(logits, target, *, gamma=0.0, alpha=None, size_average=True,
               tile_n=None, tile_v=None):
    """Pallas-TPU FocalLoss forward.

    logits: (N, V) float array (f32 or bf16), target: (N,) integer indices.
    alpha: None | float | list-of-floats (PyTorch FocalLoss semantics).
    Returns a float32 scalar (mean if size_average else sum).
    """
    n, v = logits.shape
    target_i32 = target.astype(jnp.int32)
    target2d = target_i32.reshape(n, 1)

    use_alpha = alpha is not None
    if use_alpha:
        if isinstance(alpha, (float, int)) and not isinstance(alpha, bool):
            alpha_vec = jnp.array([alpha, 1.0 - alpha], dtype=jnp.float32)
        elif isinstance(alpha, (list, tuple)):
            alpha_vec = jnp.array(alpha, dtype=jnp.float32)
        else:
            alpha_vec = jnp.asarray(alpha, dtype=jnp.float32).reshape(-1)
        # alpha[target] gather hoisted out of the kernel (tiny (V,) table).
        # NOTE: PyTorch would raise on target >= len(alpha); jnp.take clamps.
        alpha_per_row = jnp.take(alpha_vec, target_i32, axis=0).reshape(n, 1)
    else:
        alpha_per_row = jnp.ones((n, 1), dtype=jnp.float32)

    auto_tn, auto_tv = _choose_tiles(n, v, logits.dtype)
    if tile_n is None:
        tile_n = auto_tn
    if tile_v is None:
        tile_v = auto_tv

    num_row_tiles = -(-n // tile_n)
    num_v_tiles = -(-v // tile_v)

    kernel = functools.partial(
        _focal_loss_kernel,
        gamma=float(gamma), use_alpha=use_alpha,
        n_total=n, v_total=v, tile_n=tile_n, tile_v=tile_v)

    partials = pl.pallas_call(
        kernel,
        out_shape=jax.ShapeDtypeStruct((num_row_tiles, 1, 1), jnp.float32),
        grid_spec=pltpu.PrefetchScalarGridSpec(
            num_scalar_prefetch=0,
            grid=(num_row_tiles, num_v_tiles),
            in_specs=[
                # Logits travel in their native dtype (bf16 stays bf16 on the
                # wire); target / alpha rows have a j-independent block index,
                # so they are DMA'd once per row tile, not per vocab chunk.
                pl.BlockSpec((tile_n, tile_v), lambda i, j: (i, j)),
                pl.BlockSpec((tile_n, 1), lambda i, j: (i, 0)),
                pl.BlockSpec((tile_n, 1), lambda i, j: (i, 0)),
            ],
            out_specs=pl.BlockSpec((1, 1, 1), lambda i, j: (i, 0, 0)),
            scratch_shapes=[pltpu.VMEM((tile_n, 1), jnp.float32),   # running max
                            pltpu.VMEM((tile_n, 1), jnp.float32),   # running sumexp
                            pltpu.VMEM((tile_n, 1), jnp.float32)],  # target logit
        ),
        compiler_params=pltpu.CompilerParams(
            dimension_semantics=("parallel", "arbitrary"),
            vmem_limit_bytes=48 * 1024 * 1024),
    )(logits, target2d, alpha_per_row)

    total = jnp.sum(partials)
    if size_average:
        total = total / jnp.float32(n)
    return total


def _focal_loss_ref(logits, target, *, gamma, alpha, size_average):
    """Pure-JAX reference mirroring the PyTorch module."""
    logp = jax.nn.log_softmax(logits.astype(jnp.float32), axis=1)
    logpt = jnp.take_along_axis(
        logp, target.reshape(-1, 1).astype(jnp.int32), axis=1)[:, 0]
    pt = jnp.exp(logpt)
    if alpha is not None:
        if isinstance(alpha, (float, int)) and not isinstance(alpha, bool):
            a = jnp.array([alpha, 1.0 - alpha], dtype=jnp.float32)
        else:
            a = jnp.array(alpha, dtype=jnp.float32)
        logpt = logpt * a[target]
    loss = -1.0 * (1.0 - pt) ** gamma * logpt
    return jnp.mean(loss) if size_average else jnp.sum(loss)


if __name__ == "__main__":
    key = jax.random.PRNGKey(0)
    k1, k2, k3, k4, k5, k6, k7, k8 = jax.random.split(key, 8)

    # Test 1: small f32, per-class alpha list, integer gamma, mean reduction.
    N1, V1 = 8, 32
    logits1 = jax.random.normal(k1, (N1, V1), dtype=jnp.float32)
    target1 = jax.random.randint(k2, (N1,), 0, V1, dtype=jnp.int32)
    alpha1 = [0.5 + 0.5 * (i / (V1 - 1)) for i in range(V1)]
    out1 = focal_loss(logits1, target1, gamma=2.0, alpha=alpha1,
                      size_average=True)
    ref1 = _focal_loss_ref(logits1, target1, gamma=2.0, alpha=alpha1,
                           size_average=True)

    # Test 2: multi-row-tile grid with a ragged last row tile, no alpha, sum.
    N2, V2 = 40, 128
    logits2 = jax.random.normal(k3, (N2, V2), dtype=jnp.float32)
    target2 = jax.random.randint(k4, (N2,), 0, V2, dtype=jnp.int32)
    out2 = focal_loss(logits2, target2, gamma=2.0, alpha=None,
                      size_average=False, tile_n=16)
    ref2 = _focal_loss_ref(logits2, target2, gamma=2.0, alpha=None,
                           size_average=False)

    # Test 3: bf16 logits DMA'd and max-reduced in bf16, scalar alpha (binary
    # torch semantics -> targets in {0,1}), non-integer gamma (exp/log pow).
    N3, V3 = 64, 256
    logits3 = jax.random.normal(k5, (N3, V3),
                                dtype=jnp.float32).astype(jnp.bfloat16)
    target3 = jax.random.randint(k6, (N3,), 0, 2, dtype=jnp.int32)
    out3 = focal_loss(logits3, target3, gamma=1.5, alpha=0.25,
                      size_average=True, tile_n=32)
    ref3 = _focal_loss_ref(logits3, target3, gamma=1.5, alpha=0.25,
                           size_average=True)

    # Test 4: vocab-chunked online log-sum-exp path with a ragged last V chunk
    # (320 = 128 + 128 + 64) and multiple row tiles.
    N4, V4 = 24, 320
    logits4 = jax.random.normal(k7, (N4, V4), dtype=jnp.float32)
    target4 = jax.random.randint(k8, (N4,), 0, V4, dtype=jnp.int32)
    out4 = focal_loss(logits4, target4, gamma=2.0, alpha=None,
                      size_average=True, tile_n=8, tile_v=128)
    ref4 = _focal_loss_ref(logits4, target4, gamma=2.0, alpha=None,
                           size_average=True)

    out1, out2, out3, out4 = jax.block_until_ready((out1, out2, out3, out4))
    assert jnp.allclose(out1, ref1, rtol=1e-5, atol=1e-5), (out1, ref1)
    assert jnp.allclose(out2, ref2, rtol=1e-4, atol=1e-4), (out2, ref2)
    assert jnp.allclose(out3, ref3, rtol=1e-4, atol=1e-4), (out3, ref3)
    assert jnp.allclose(out4, ref4, rtol=1e-5, atol=1e-5), (out4, ref4)

    print("KERNEL_OK")
</pallas_src>

<mosaic_0001>
module attributes {stable_mosaic.version = 11 : i64} {
  func.func @_focal_loss_kernel(%arg0: i32, %arg1: i32, %arg2: memref<8x32xf32, #tpu.memory_space<vmem>>, %arg3: memref<8x1xi32, #tpu.memory_space<vmem>>, %arg4: memref<8x1xf32, #tpu.memory_space<vmem>>, %arg5: memref<1x1x1xf32, #tpu.memory_space<vmem>>, %arg6: memref<8x1xf32, #tpu.memory_space<vmem>>, %arg7: memref<8x1xf32, #tpu.memory_space<vmem>>, %arg8: memref<8x1xf32, #tpu.memory_space<vmem>>) attributes {dimension_semantics = [#tpu.dimension_semantics<parallel>, #tpu.dimension_semantics<arbitrary>], iteration_bounds = array<i64: 1, 1>, scalar_prefetch = 0 : i64, scratch_operands = 3 : i64, tpu.core_type = #tpu.core_type<tc>, window_params = [{transform_indices = @transform_0, window_bounds = array<i64: 8, 32>}, {transform_indices = @transform_1, window_bounds = array<i64: 8, 1>}, {transform_indices = @transform_2, window_bounds = array<i64: 8, 1>}, {transform_indices = @transform_3, window_bounds = array<i64: 1, 1, 1>}]} {
    %c0 = arith.constant 0 : index
    %c0_0 = arith.constant 0 : index
    %0 = vector.load %arg2[%c0, %c0_0] : memref<8x32xf32, #tpu.memory_space<vmem>>, vector<8x32xf32>
    %c0_1 = arith.constant 0 : index
    %c0_2 = arith.constant 0 : index
    %1 = vector.load %arg3[%c0_1, %c0_2] : memref<8x1xi32, #tpu.memory_space<vmem>>, vector<8x1xi32>
    %2 = tpu.iota {dimensions = array<i32: 1>} : vector<8x32xi32>
    %c32_i32 = arith.constant 32 : i32
    %3 = arith.muli %arg1, %c32_i32 : i32
    %4 = vector.broadcast %3 : i32 to vector<8x32xi32>
    %5 = arith.addi %2, %4 : vector<8x32xi32>
    %c0_i32 = arith.constant 0 : i32
    %6 = arith.cmpi eq, %arg1, %c0_i32 : i32
    %7 = arith.extui %6 : i1 to i32
    %c0_i32_3 = arith.constant 0 : i32
    %8 = arith.cmpi ne, %7, %c0_i32_3 : i32
    scf.if %8 {
      %cst_21 = arith.constant 0xFF800000 : f32
      %37 = vector.broadcast %cst_21 : f32 to vector<8x1xf32>
      %c0_22 = arith.constant 0 : index
      %c0_23 = arith.constant 0 : index
      %38 = vector.load %arg6[%c0_22, %c0_23] : memref<8x1xf32, #tpu.memory_space<vmem>>, vector<8x1xf32>
      tpu.vector_store %arg6[%c0_22, %c0_23], %37 {strides = array<i32>} : memref<8x1xf32, #tpu.memory_space<vmem>>, vector<8x1xf32>,
      %cst_24 = arith.constant 0.000000e+00 : f32
      %39 = vector.broadcast %cst_24 : f32 to vector<8x1xf32>
      %c0_25 = arith.constant 0 : index
      %c0_26 = arith.constant 0 : index
      %40 = vector.load %arg7[%c0_25, %c0_26] : memref<8x1xf32, #tpu.memory_space<vmem>>, vector<8x1xf32>
      tpu.vector_store %arg7[%c0_25, %c0_26], %39 {strides = array<i32>} : memref<8x1xf32, #tpu.memory_space<vmem>>, vector<8x1xf32>,
      %cst_27 = arith.constant 0.000000e+00 : f32
      %41 = vector.broadcast %cst_27 : f32 to vector<8x1xf32>
      %c0_28 = arith.constant 0 : index
      %c0_29 = arith.constant 0 : index
      %42 = vector.load %arg8[%c0_28, %c0_29] : memref<8x1xf32, #tpu.memory_space<vmem>>, vector<8x1xf32>
      tpu.vector_store %arg8[%c0_28, %c0_29], %41 {strides = array<i32>} : memref<8x1xf32, #tpu.memory_space<vmem>>, vector<8x1xf32>,
    } else {
    }
    %cst = arith.constant dense<0xFF800000> : vector<8xf32>
    %9 = vector.multi_reduction <maximumf>, %0, %cst [1] : vector<8x32xf32> to vector<8xf32>
    %10 = vector.shape_cast %9 : vector<8xf32> to vector<8x1xf32>
    %11 = vector.broadcast %1 : vector<8x1xi32> to vector<8x32xi32>
    %12 = arith.cmpi eq, %5, %11 : vector<8x32xi32>
    %cst_4 = arith.constant 0.000000e+00 : f32
    %13 = vector.broadcast %cst_4 : f32 to vector<8x32xf32>
    %14 = arith.select %12, %0, %13 : vector<8x32xi1>, vector<8x32xf32>
    %cst_5 = arith.constant dense<0.000000e+00> : vector<8xf32>
    %15 = vector.multi_reduction <add>, %14, %cst_5 [1] : vector<8x32xf32> to vector<8xf32>
    %16 = vector.shape_cast %15 : vector<8xf32> to vector<8x1xf32>
    %c0_6 = arith.constant 0 : index
    %c0_7 = arith.constant 0 : index
    %17 = vector.load %arg6[%c0_6, %c0_7] : memref<8x1xf32, #tpu.memory_space<vmem>>, vector<8x1xf32>
    %18 = arith.maximumf %17, %10 : vector<8x1xf32>
    %19 = vector.broadcast %18 : vector<8x1xf32> to vector<8x32xf32>
    %20 = arith.subf %0, %19 : vector<8x32xf32>
    %21 = math.exp %20 : vector<8x32xf32>
    %cst_8 = arith.constant dense<0.000000e+00> : vector<8xf32>
    %22 = vector.multi_reduction <add>, %21, %cst_8 [1] : vector<8x32xf32> to vector<8xf32>
    %23 = vector.shape_cast %22 : vector<8xf32> to vector<8x1xf32>
    %c0_9 = arith.constant 0 : index
    %c0_10 = arith.constant 0 : index
    %24 = vector.load %arg7[%c0_9, %c0_10] : memref<8x1xf32, #tpu.memory_space<vmem>>, vector<8x1xf32>
    %25 = arith.subf %17, %18 : vector<8x1xf32>
    %26 = math.exp %25 : vector<8x1xf32>
    %27 = arith.mulf %24, %26 : vector<8x1xf32>
    %28 = arith.addf %27, %23 : vector<8x1xf32>
    %c0_11 = arith.constant 0 : index
    %c0_12 = arith.constant 0 : index
    %29 = vector.load %arg7[%c0_11, %c0_12] : memref<8x1xf32, #tpu.memory_space<vmem>>, vector<8x1xf32>
    tpu.vector_store %arg7[%c0_11, %c0_12], %28 {strides = array<i32>} : memref<8x1xf32, #tpu.memory_space<vmem>>, vector<8x1xf32>,
    %c0_13 = arith.constant 0 : index
    %c0_14 = arith.constant 0 : index
    %30 = vector.load %arg6[%c0_13, %c0_14] : memref<8x1xf32, #tpu.memory_space<vmem>>, vector<8x1xf32>
    tpu.vector_store %arg6[%c0_13, %c0_14], %18 {strides = array<i32>} : memref<8x1xf32, #tpu.memory_space<vmem>>, vector<8x1xf32>,
    %c0_15 = arith.constant 0 : index
    %c0_16 = arith.constant 0 : index
    %31 = vector.load %arg8[%c0_15, %c0_16] : memref<8x1xf32, #tpu.memory_space<vmem>>, vector<8x1xf32>
    %32 = arith.addf %31, %16 : vector<8x1xf32>
    %c0_17 = arith.constant 0 : index
    %c0_18 = arith.constant 0 : index
    %33 = vector.load %arg8[%c0_17, %c0_18] : memref<8x1xf32, #tpu.memory_space<vmem>>, vector<8x1xf32>
    tpu.vector_store %arg8[%c0_17, %c0_18], %32 {strides = array<i32>} : memref<8x1xf32, #tpu.memory_space<vmem>>, vector<8x1xf32>,
    %c0_i32_19 = arith.constant 0 : i32
    %34 = arith.cmpi eq, %arg1, %c0_i32_19 : i32
    %35 = arith.extui %34 : i1 to i32
    %c0_i32_20 = arith.constant 0 : i32
    %36 = arith.cmpi ne, %35, %c0_i32_20 : i32
    scf.if %36 {
      %c0_21 = arith.constant 0 : index
      %c0_22 = arith.constant 0 : index
      %37 = vector.load %arg8[%c0_21, %c0_22] : memref<8x1xf32, #tpu.memory_space<vmem>>, vector<8x1xf32>
      %c0_23 = arith.constant 0 : index
      %c0_24 = arith.constant 0 : index
      %38 = vector.load %arg6[%c0_23, %c0_24] : memref<8x1xf32, #tpu.memory_space<vmem>>, vector<8x1xf32>
      %39 = arith.subf %37, %38 : vector<8x1xf32>
      %c0_25 = arith.constant 0 : index
      %c0_26 = arith.constant 0 : index
      %40 = vector.load %arg7[%c0_25, %c0_26] : memref<8x1xf32, #tpu.memory_space<vmem>>, vector<8x1xf32>
      %41 = math.log %40 : vector<8x1xf32>
      %42 = arith.subf %39, %41 : vector<8x1xf32>
      %43 = math.exp %42 : vector<8x1xf32>
      %c0_27 = arith.constant 0 : index
      %c0_28 = arith.constant 0 : index
      %44 = vector.load %arg4[%c0_27, %c0_28] : memref<8x1xf32, #tpu.memory_space<vmem>>, vector<8x1xf32>
      %45 = arith.mulf %42, %44 : vector<8x1xf32>
      %cst_29 = arith.constant 1.000000e+00 : f32
      %46 = vector.broadcast %cst_29 : f32 to vector<8x1xf32>
      %47 = arith.subf %46, %43 : vector<8x1xf32>
      %48 = arith.mulf %47, %47 : vector<8x1xf32>
      %cst_30 = arith.constant -1.000000e+00 : f32
      %49 = vector.broadcast %cst_30 : f32 to vector<8x1xf32>
      %50 = arith.mulf %49, %48 : vector<8x1xf32>
      %51 = arith.mulf %50, %45 : vector<8x1xf32>
      %52 = tpu.iota {dimensions = array<i32: 0>} : vector<8x1xi32>
      %c8_i32 = arith.constant 8 : i32
      %53 = arith.muli %arg0, %c8_i32 : i32
      %54 = vector.broadcast %53 : i32 to vector<8x1xi32>
      %55 = arith.addi %52, %54 : vector<8x1xi32>
      %c8_i32_31 = arith.constant 8 : i32
      %56 = vector.broadcast %c8_i32_31 : i32 to vector<8x1xi32>
      %57 = arith.cmpi slt, %55, %56 : vector<8x1xi32>
      %cst_32 = arith.constant 0.000000e+00 : f32
      %58 = vector.broadcast %cst_32 : f32 to vector<8x1xf32>
      %59 = arith.select %57, %51, %58 : vector<8x1xi1>, vector<8x1xf32>
      %60 = vector.shape_cast %59 : vector<8x1xf32> to vector<1x8x1xf32>
      %cst_33 = arith.constant dense<0.000000e+00> : vector<1xf32>
      %61 = vector.multi_reduction <add>, %60, %cst_33 [1, 2] : vector<1x8x1xf32> to vector<1xf32>
      %62 = vector.shape_cast %61 : vector<1xf32> to vector<1x1x1xf32>
      %63 = vector.extract %62[0, 0, 0] : f32 from vector<1x1x1xf32>
      %64 = vector.broadcast %63 : f32 to vector<1x1x1xf32>
      %c0_34 = arith.constant 0 : index
      %c0_35 = arith.constant 0 : index
      %c0_36 = arith.constant 0 : index
      %65 = vector.load %arg5[%c0_34, %c0_35, %c0_36] : memref<1x1x1xf32, #tpu.memory_space<vmem>>, vector<1x1x1xf32>
      tpu.vector_store %arg5[%c0_34, %c0_35, %c0_36], %64 {strides = array<i32>} : memref<1x1x1xf32, #tpu.memory_space<vmem>>, vector<1x1x1xf32>,
    } else {
    }
    return
  }
  func.func @transform_0(%arg0: i32, %arg1: i32) -> (i32, i32) {
    %c0_i32 = arith.constant 0 : i32
    return %arg0, %arg1 : i32, i32
  }
  func.func @transform_1(%arg0: i32, %arg1: i32) -> (i32, i32) {
    %c0_i32 = arith.constant 0 : i32
    %c0_i32_0 = arith.constant 0 : i32
    return %arg0, %c0_i32 : i32, i32
  }
  func.func @transform_2(%arg0: i32, %arg1: i32) -> (i32, i32) {
    %c0_i32 = arith.constant 0 : i32
    %c0_i32_0 = arith.constant 0 : i32
    return %arg0, %c0_i32 : i32, i32
  }
  func.func @transform_3(%arg0: i32, %arg1: i32) -> (i32, i32, i32) {
    %c0_i32 = arith.constant 0 : i32
    %c0_i32_0 = arith.constant 0 : i32
    %c0_i32_1 = arith.constant 0 : i32
    return %arg0, %c0_i32, %c0_i32_0 : i32, i32, i32
  }
}

</mosaic_0001>

<bundles_post_ra>
// kernel: tpu_custom_call.1
= control target key start
LH: loop header
LB: loop body
LE: loop exit
PB: predicated region body
PF: predicated region fallthrough
CT: control target
= control target key end

     0   :  { %vm30_vm0 = vcmask 261120   ;;  %vm26_vm1 = vcmask 7168   ;;  %s214_s0 = inlined_call_operand.vmem [shape: f32[8,32], index: 0, kind: input, shape index: {}]   ;;  %s215_s1 = inlined_call_operand.vmem [shape: s32[8,1], index: 1, kind: input, shape index: {}]   ;;  %s216_s2 = inlined_call_operand.vmem [shape: f32[8,1], index: 2, kind: input, shape index: {}]   ;;  %s217_s3 = inlined_call_operand.hbm [shape: f32[1,1,1], index: 3, kind: output, shape index: {}]  }
   0x1   :  { %v15_v0 = vld [vmem:[%s214_s0] sm:$0xff] }
   0x2   :  { %8 = vsyncpa [#allocation6], 0  ;;  %v31_v1 = vsel %vm30_vm0, %v15_v0, -inf  ;;  %v159_v2 = vmov -inf   ;;  %v160_v3 = vmov 0   ;;  %v16_v4 = vld [vmem:[%s215_s1] sm:$0xff]  ;;  %v17_v13 = vlaneseq }
   0x3   :  { %27 = vst.msk [vmem:[#allocation2] sm:$0xff] %vm26_vm1, %v159_v2  ;;  %32 = vmax.xlane.f32.xlu0 %v31_v1  ;;  %126 = vset.pattern.permute.xlu1 %v160_v3  ;;  %v161_v5 = vmov 0.0   ;;  %v79_v39 = vld [vmem:[%s216_s2] sm:$0xff]  ;;  %s162_s16 = smov [#allocation5]   ;;  %vm103_vm3 = vcmask 0  }
   0x4   :  { %125 = vset.pattern.permute.xlu0 %v160_v3  ;;  %35 = vperm.xlu1 %126, %v16_v4   ;;  %28 = vst.msk [vmem:[#allocation3] sm:$0xff] %vm26_vm1, %v161_v5  ;;  %29 = vst.msk [vmem:[#allocation4] sm:$0xff] %vm26_vm1, %v161_v5  ;;  %v18_v14 = vand.u32 127, %v17_v13  ;;  %s111_s17 = sshll.u32 %s162_s16, 4  ;;  %s112_s17 = int_to_ptr.vmem [resolvable:$true] %s111_s17 }
   0x5   :  { %s135_s2 = scalar_lea.vmem %s112_s17, 16  ;;  %s139_s19 = scalar_lea.vmem %s112_s17, 32 }
   0x6   :  { %p136_p0 = scmp.ne.s32.totalorder %s112_s17, %s135_s2  ;;  %p140_p1 = scmp.lt.s32.totalorder %s112_s17, %s112_s17 }
   0x7   :  { %p141_p2 = scmp.lt.s32.totalorder %s139_s19, %s135_s2 }
   0x9   :  { %p142_p3 = por %p141_p2, %p140_p1 }
   0xa   :  { %v42_v6 = vld [vmem:[#allocation2] sm:$0xff] }
   0xb   :  { %v55_v22 = vld [vmem:[#allocation3] sm:$0xff]  ;;  %v64_v26 = vld [vmem:[#allocation4] sm:$0xff]  ;;  %p143_p4 = pnand %p142_p3, %p136_p0 }
  0x83   :  { %v36_v15 = vpop.permute.xlu1 %35 }
  0x84   :  { %vm37_vm2 = vcmp.eq.s32.totalorder %v18_v14, %v36_v15 }
  0x85   :  { %v38_v17 = vsel %vm37_vm2, %v15_v0, 0.0 }
  0x86   :  { %v39_v19 = vsel %vm30_vm0, %v38_v17, 0.0 }
  0x90   :  { %v33_v7 = vpop.xlane.xlu0 %32 }
  0x91   :  { %v43_v8 = vmax.f32 %v42_v6, %v33_v7 }
  0x93   :  { %v56_v9 = vsub.f32 %v42_v6, %v43_v8  ;;  %63 = vst.msk [vmem:[#allocation2] sm:$0xff] %vm26_vm1, %v43_v8  ;;  %46 = vperm.xlu0 %125, %v43_v8  }
  0x95   :  { %v57_v20 = vmul.f32 1.442695, %v56_v9 }
  0x9a   :  { %v71_v32 = vld [vmem:[#allocation2] sm:$0xff] }
 0x112   :  { %v47_v10 = vpop.permute.xlu0 %46 }
 0x113   :  { %v49_v11 = vsub.f32 %v15_v0, %v47_v10 }
 0x115   :  { %v50_v12 = vmul.f32 1.442695, %v49_v11 }
 0x117   :  { %127 = vpow2.f32 %v50_v12 }
 0x118   :  { %129 = vpow2.f32 %v57_v20 }
 0x121   :  { %v128_v16 = vpop.eup %127 }
 0x122   :  { %v52_v18 = vsel %vm30_vm0, %v128_v16, 0.0  ;;  %v130_v21 = vpop.eup %129 }
 0x123   :  { %53 = vadd.xlane.f32.xlu1 %v52_v18  ;;  %v59_v23 = vmul.f32 %v130_v21, %v55_v22 }
 0x127   :  { %40 = vadd.xlane.f32.xlu1 %v39_v19 }
 0x1b0   :  { %v54_v24 = vpop.xlane.xlu1 %53 }
 0x1b1   :  { %v60_v25 = vadd.f32 %v59_v23, %v54_v24 }
 0x1b3   :  { %62 = vst.msk [vmem:[#allocation3] sm:$0xff] %vm26_vm1, %v60_v25 }
 0x1b4   :  { %v41_v27 = vpop.xlane.xlu1 %40 }
 0x1b5   :  { %v65_v28 = vadd.f32 %v64_v26, %v41_v27 }
 0x1b7   :  { %66 = vst.msk [vmem:[#allocation4] sm:$0xff] %vm26_vm1, %v65_v28 }
 0x1ba   :  { %v73_v29 = vld [vmem:[#allocation3] sm:$0xff] }
 0x1bb   :  { %131 = vlog2.f32 %v73_v29 }
 0x1be   :  { %v70_v30 = vld [vmem:[#allocation4] sm:$0xff] }
 0x1bf   :  { %v72_v33 = vsub.f32 %v70_v30, %v71_v32 }
 0x1c5   :  { %v132_v31 = vpop.eup %131 }
 0x1c6   :  { %v75_v34 = vmul.f32 0.6931472, %v132_v31 }
 0x1c8   :  { %v76_v35 = vsub.f32 %v72_v33, %v75_v34 }
 0x1ca   :  { %v77_v36 = vmul.f32 1.442695, %v76_v35  ;;  %v80_v41 = vmul.f32 %v79_v39, %v76_v35 }
 0x1cc   :  { %133 = vpow2.f32 %v77_v36 }
 0x1d6   :  { %v134_v37 = vpop.eup %133 }
 0x1d7   :  { %v81_v38 = vsub.f32 1.0, %v134_v37 }
 0x1d9   :  { %v82_v40 = vmul.f32 %v81_v38, %v81_v38 }
 0x1db   :  { %v83_v42 = vmul.f32 -1.0, %v82_v40 }
 0x1dd   :  { %v84_v43 = vmul.f32 %v83_v42, %v80_v41 }
 0x1df   :  { %v92_v44 = vsel %vm26_vm1, %v84_v43, 0.0 }
 0x1e0   :  { %93 = vadd.xlane.f32.xlu1 %v92_v44 }
 0x26d   :  { %v94_v45 = vpop.xlane.xlu1 %93 }
 0x26e   :  { %v95_v46 = vrot.slane %v94_v45, 4 }
 0x270   :  { %v96_v47 = vadd.f32 %v95_v46, %v94_v45 }
 0x272   :  { %v97_v48 = vrot.slane %v96_v47, 2 }
 0x274   :  { %v98_v49 = vadd.f32 %v97_v48, %v96_v47 }
 0x276   :  { %v99_v50 = vrot.slane %v98_v49, 1 }
 0x278   :  { %v100_v51 = vadd.f32 %v99_v50, %v98_v49 }
 0x27a   :  { %119 = vpush %v100_v51 }
 0x2ab   :  { %s120_s18 = spop %119 }
 0x2ac   :  { %v102_v52 = vstv %s120_s18 }
 0x2ad   :  { %104 = vst.msk [vmem:[#allocation5] sm:$0x1] %vm103_vm3, %v102_v52 }
 0x2ae   :  { %146 = shalt.err (!%p143_p4)
}
 0x2af   :  { %s147_s22 = scalar_lea.hbm %s217_s3, 16 }
 0x2b0   :  { %p148_p5 = scmp.ne.s32.totalorder %s217_s3, %s147_s22  ;;  %p151_p6 = scmp.lt.u32.totalorder %s147_s22, %s217_s3 }
 0x2b2   :  { %p153_p7 = pnand %p151_p6, %p148_p5 }
 0x2b4   :  { %156 = shalt.err (!%p153_p7)
}
 0x2b5   :  { %114 = dma.vmem_to_hbm [thread:$0]  %s112_s17, 16, %s217_s3, [#allocation6]  }
 0x2b6   :  { %157 = dma.done.wait [#allocation6], 16  }
 0x2b7   :  { %158 = vsyncadd [#allocation6], 4294967280 }
 0x2b8   :  { %118 = vsyncpa [#allocation6], 1 }

</bundles_post_ra>
